<compile_context>
chip_gen: v5e
topology: v5e:2x2
jax: 0.10.0
libtpu: 0.0.40
codegen_flags: <defaults>
</compile_context>

<pallas_src>
import functools

import jax
import jax.numpy as jnp
from jax import lax
from jax.experimental import pallas as pl
from jax.experimental.pallas import tpu as pltpu

LANES = 128  # lane-dense output width
TB = 8       # batch rows per grid step (sublane-dense tile)


def _log_sigmoid(x):
    # numerically stable logsigmoid: min(x, 0) - log1p(exp(-|x|))
    return jnp.minimum(x, 0.0) - jnp.log1p(jnp.exp(-jnp.abs(x)))


def skipgram_kernel(in_ids_ref, ctx_ids_ref,     # scalar-prefetch ids (SMEM, 1D)
                    table_ref,                   # (V, E_pad) VMEM-resident table
                    out_ref,                     # (TB, LANES) per-tile output
                    center_scr, ctx_scr,         # VMEM scratch
                    *, tb, num_pos, num_neg):
    num_ctx = num_pos + num_neg
    base = pl.program_id(0) * tb

    # ---- gather: center row + all context rows for this batch tile ----------
    def gather_b(b, carry):
        center_scr[b, :] = table_ref[in_ids_ref[base + b], :]

        def gather_r(r, carry2):
            ctx_scr[b, r, :] = table_ref[ctx_ids_ref[(base + b) * num_ctx + r], :]
            return carry2

        return lax.fori_loop(0, num_ctx, gather_r, carry, unroll=True)

    lax.fori_loop(0, tb, gather_b, 0)

    # ---- vectorized score + logsigmoid + reduction over context axis --------
    centers = center_scr[...].astype(jnp.float32)               # (tb, E)
    ctx = ctx_scr[...].astype(jnp.float32)                       # (tb, R, E)
    scores = jnp.sum(ctx * centers[:, None, :], axis=-1)         # (tb, R)

    # +1 for the first num_pos columns (positives), -1 for negatives (constant).
    col = lax.broadcasted_iota(jnp.int32, (tb, num_ctx), 1)
    sign = jnp.where(col < num_pos, jnp.float32(1.0), jnp.float32(-1.0))

    terms = _log_sigmoid(scores * sign)                          # (tb, R)
    loss = -jnp.sum(terms, axis=-1, keepdims=True)               # (tb, 1)
    out_ref[...] = jnp.broadcast_to(loss, out_ref.shape)         # (tb, LANES)


def skipgram_forward(table, input_labels, pos_labels, neg_labels, *, tb=TB):
    """Pallas forward. Returns loss of shape (B,), matching the PyTorch -loss."""
    V, E = table.shape
    B = input_labels.shape[0]
    C = pos_labels.shape[1]
    N = neg_labels.shape[1]
    R = C + N

    # Lane-align the embedding dim (zero padding leaves dot products unchanged).
    e_pad = max(LANES, ((E + LANES - 1) // LANES) * LANES)
    if e_pad != E:
        table = jnp.pad(table, ((0, 0), (0, e_pad - E)))

    # Clamp ids (PyTorch nn.Embedding would raise on OOB; we clamp instead) and
    # pad the batch to a multiple of the tile size.
    # TODO(synk): no in-kernel bounds check on token ids (clamped in wrapper only).
    b_pad = ((B + tb - 1) // tb) * tb
    in_ids = jnp.clip(input_labels.astype(jnp.int32).reshape(B), 0, V - 1)
    ctx = jnp.concatenate(
        [pos_labels.astype(jnp.int32), neg_labels.astype(jnp.int32)], axis=1)
    ctx = jnp.clip(ctx, 0, V - 1)
    if b_pad != B:
        in_ids = jnp.pad(in_ids, (0, b_pad - B))
        ctx = jnp.pad(ctx, ((0, b_pad - B), (0, 0)))
    ctx_ids = ctx.reshape(b_pad * R)   # 1D → cheap SMEM layout (no 128-lane pad)

    # TODO(synk): for vocabularies too large for VMEM (v7x: 64 MiB/TC), switch the
    # table to memory_space=pl.ANY and batch per-tile row gathers with
    # pltpu.make_async_copy; here the table is kept VMEM-resident.
    table_bytes = table.size * table.dtype.itemsize
    vmem_limit = min(64 * 1024 * 1024,
                     max(32 * 1024 * 1024, 2 * table_bytes + (4 << 20)))

    kernel = functools.partial(skipgram_kernel, tb=tb, num_pos=C, num_neg=N)

    out = pl.pallas_call(
        kernel,
        out_shape=jax.ShapeDtypeStruct((b_pad, LANES), jnp.float32),
        grid_spec=pltpu.PrefetchScalarGridSpec(
            num_scalar_prefetch=2,
            grid=(b_pad // tb,),
            in_specs=[
                # whole table, VMEM-resident (constant block index)
                pl.BlockSpec((V, e_pad), lambda i, in_ids, ctx_ids: (0, 0)),
            ],
            out_specs=pl.BlockSpec((tb, LANES),
                                   lambda i, in_ids, ctx_ids: (i, 0)),
            scratch_shapes=[
                pltpu.VMEM((tb, e_pad), table.dtype),       # center rows
                pltpu.VMEM((tb, R, e_pad), table.dtype),    # context rows
            ],
        ),
        compiler_params=pltpu.CompilerParams(
            dimension_semantics=("parallel",),
            vmem_limit_bytes=vmem_limit),
    )(in_ids, ctx_ids, table)

    # every lane of a row holds that row's loss; take lane 0, drop batch padding
    return out[:B, 0]


def skipgram_ref(table, input_labels, pos_labels, neg_labels):
    """Pure-JAX reference matching the PyTorch module semantics."""
    in_emb = table[input_labels]            # (B, E)
    pos_emb = table[pos_labels]             # (B, C, E)
    neg_emb = table[neg_labels]             # (B, N, E)
    log_pos = jnp.einsum('bce,be->bc', pos_emb, in_emb)
    log_neg = jnp.einsum('bne,be->bn', neg_emb, -in_emb)
    lp = jax.nn.log_sigmoid(log_pos).sum(1)
    ln = jax.nn.log_sigmoid(log_neg).sum(1)
    return -(lp + ln)


if __name__ == "__main__":
    vocab_size = 64
    embed_size = 32
    B = 2        # batch
    C = 4        # positive context words per center word
    K = 2        # negatives per positive
    N = C * K    # total negatives per center word

    key = jax.random.PRNGKey(0)
    k_tab, k_in, k_pos, k_neg = jax.random.split(key, 4)

    # nn.Embedding weight, uniform_(-0.5/embed_size, 0.5/embed_size)
    initrange = 0.5 / embed_size
    table = jax.random.uniform(
        k_tab, (vocab_size, embed_size),
        minval=-initrange, maxval=initrange, dtype=jnp.float32)

    input_labels = jax.random.randint(k_in, (B,), 0, vocab_size, dtype=jnp.int32)
    pos_labels = jax.random.randint(k_pos, (B, C), 0, vocab_size, dtype=jnp.int32)
    neg_labels = jax.random.randint(k_neg, (B, N), 0, vocab_size, dtype=jnp.int32)

    out = skipgram_forward(table, input_labels, pos_labels, neg_labels)
    out = jax.block_until_ready(out)

    ref = skipgram_ref(table, input_labels, pos_labels, neg_labels)
    assert out.shape == (B,)
    assert jnp.allclose(out, ref, rtol=1e-5, atol=1e-5), (out, ref)

    print("KERNEL_OK")
</pallas_src>

<mosaic_0001>
module attributes {stable_mosaic.version = 11 : i64} {
  func.func @skipgram_kernel(%arg0: i32, %arg1: memref<8xi32, #tpu.memory_space<smem>>, %arg2: memref<96xi32, #tpu.memory_space<smem>>, %arg3: memref<64x128xf32, #tpu.memory_space<vmem>>, %arg4: memref<8x128xf32, #tpu.memory_space<vmem>>, %arg5: memref<8x128xf32, #tpu.memory_space<vmem>>, %arg6: memref<8x12x128xf32, #tpu.memory_space<vmem>>) attributes {dimension_semantics = [#tpu.dimension_semantics<parallel>], iteration_bounds = array<i64: 1>, scalar_prefetch = 2 : i64, scratch_operands = 2 : i64, tpu.core_type = #tpu.core_type<tc>, window_params = [{pipeline_mode = #tpu.pipeline_mode<synchronous>, transform_indices = @transform_0, window_bounds = array<i64: 64, 128>}, {transform_indices = @transform_1, window_bounds = array<i64: 8, 128>}]} {
    %c8_i32 = arith.constant 8 : i32
    %0 = arith.muli %arg0, %c8_i32 : i32
    %c0_i32 = arith.constant 0 : i32
    %c8_i32_0 = arith.constant 8 : i32
    %1 = arith.addi %c0_i32, %c8_i32_0 : i32
    %c1_i32 = arith.constant 1 : i32
    scf.for %arg7 = %c0_i32 to %1 step %c1_i32  : i32 {
      %30 = arith.addi %0, %arg7 : i32
      %31 = arith.index_cast %30 : i32 to index
      %32 = memref.load %arg1[%31] : memref<8xi32, #tpu.memory_space<smem>>
      %33 = arith.index_cast %32 : i32 to index
      %c0_14 = arith.constant 0 : index
      %34 = vector.load %arg3[%33, %c0_14] : memref<64x128xf32, #tpu.memory_space<vmem>>, vector<1x128xf32>
      %35 = vector.shape_cast %34 : vector<1x128xf32> to vector<128xf32>
      %36 = arith.index_cast %arg7 : i32 to index
      %c0_15 = arith.constant 0 : index
      %37 = vector.load %arg5[%36, %c0_15] : memref<8x128xf32, #tpu.memory_space<vmem>>, vector<1x128xf32>
      %38 = vector.shape_cast %37 : vector<1x128xf32> to vector<128xf32>
      %39 = vector.shape_cast %35 : vector<128xf32> to vector<1x128xf32>
      tpu.vector_store %arg5[%36, %c0_15], %39 {strides = array<i32>} : memref<8x128xf32, #tpu.memory_space<vmem>>, vector<1x128xf32>,
      %c0_i32_16 = arith.constant 0 : i32
      %40 = arith.addi %0, %arg7 : i32
      %c12_i32 = arith.constant 12 : i32
      %41 = arith.muli %40, %c12_i32 : i32
      %42 = arith.addi %41, %c0_i32_16 : i32
      %43 = arith.index_cast %42 : i32 to index
      %44 = memref.load %arg2[%43] : memref<96xi32, #tpu.memory_space<smem>>
      %45 = arith.index_cast %44 : i32 to index
      %c0_17 = arith.constant 0 : index
      %46 = vector.load %arg3[%45, %c0_17] : memref<64x128xf32, #tpu.memory_space<vmem>>, vector<1x128xf32>
      %47 = vector.shape_cast %46 : vector<1x128xf32> to vector<128xf32>
      %48 = arith.index_cast %arg7 : i32 to index
      %49 = arith.index_cast %c0_i32_16 : i32 to index
      %c0_18 = arith.constant 0 : index
      %50 = vector.load %arg6[%48, %49, %c0_18] : memref<8x12x128xf32, #tpu.memory_space<vmem>>, vector<1x1x128xf32>
      %51 = vector.shape_cast %50 : vector<1x1x128xf32> to vector<128xf32>
      %52 = vector.shape_cast %47 : vector<128xf32> to vector<1x1x128xf32>
      tpu.vector_store %arg6[%48, %49, %c0_18], %52 {strides = array<i32>} : memref<8x12x128xf32, #tpu.memory_space<vmem>>, vector<1x1x128xf32>,
      %c1_i32_19 = arith.constant 1 : i32
      %53 = arith.addi %0, %arg7 : i32
      %c12_i32_20 = arith.constant 12 : i32
      %54 = arith.muli %53, %c12_i32_20 : i32
      %55 = arith.addi %54, %c1_i32_19 : i32
      %56 = arith.index_cast %55 : i32 to index
      %57 = memref.load %arg2[%56] : memref<96xi32, #tpu.memory_space<smem>>
      %58 = arith.index_cast %57 : i32 to index
      %c0_21 = arith.constant 0 : index
      %59 = vector.load %arg3[%58, %c0_21] : memref<64x128xf32, #tpu.memory_space<vmem>>, vector<1x128xf32>
      %60 = vector.shape_cast %59 : vector<1x128xf32> to vector<128xf32>
      %61 = arith.index_cast %arg7 : i32 to index
      %62 = arith.index_cast %c1_i32_19 : i32 to index
      %c0_22 = arith.constant 0 : index
      %63 = vector.load %arg6[%61, %62, %c0_22] : memref<8x12x128xf32, #tpu.memory_space<vmem>>, vector<1x1x128xf32>
      %64 = vector.shape_cast %63 : vector<1x1x128xf32> to vector<128xf32>
      %65 = vector.shape_cast %60 : vector<128xf32> to vector<1x1x128xf32>
      tpu.vector_store %arg6[%61, %62, %c0_22], %65 {strides = array<i32>} : memref<8x12x128xf32, #tpu.memory_space<vmem>>, vector<1x1x128xf32>,
      %c2_i32 = arith.constant 2 : i32
      %66 = arith.addi %0, %arg7 : i32
      %c12_i32_23 = arith.constant 12 : i32
      %67 = arith.muli %66, %c12_i32_23 : i32
      %68 = arith.addi %67, %c2_i32 : i32
      %69 = arith.index_cast %68 : i32 to index
      %70 = memref.load %arg2[%69] : memref<96xi32, #tpu.memory_space<smem>>
      %71 = arith.index_cast %70 : i32 to index
      %c0_24 = arith.constant 0 : index
      %72 = vector.load %arg3[%71, %c0_24] : memref<64x128xf32, #tpu.memory_space<vmem>>, vector<1x128xf32>
      %73 = vector.shape_cast %72 : vector<1x128xf32> to vector<128xf32>
      %74 = arith.index_cast %arg7 : i32 to index
      %75 = arith.index_cast %c2_i32 : i32 to index
      %c0_25 = arith.constant 0 : index
      %76 = vector.load %arg6[%74, %75, %c0_25] : memref<8x12x128xf32, #tpu.memory_space<vmem>>, vector<1x1x128xf32>
      %77 = vector.shape_cast %76 : vector<1x1x128xf32> to vector<128xf32>
      %78 = vector.shape_cast %73 : vector<128xf32> to vector<1x1x128xf32>
      tpu.vector_store %arg6[%74, %75, %c0_25], %78 {strides = array<i32>} : memref<8x12x128xf32, #tpu.memory_space<vmem>>, vector<1x1x128xf32>,
      %c3_i32 = arith.constant 3 : i32
      %79 = arith.addi %0, %arg7 : i32
      %c12_i32_26 = arith.constant 12 : i32
      %80 = arith.muli %79, %c12_i32_26 : i32
      %81 = arith.addi %80, %c3_i32 : i32
      %82 = arith.index_cast %81 : i32 to index
      %83 = memref.load %arg2[%82] : memref<96xi32, #tpu.memory_space<smem>>
      %84 = arith.index_cast %83 : i32 to index
      %c0_27 = arith.constant 0 : index
      %85 = vector.load %arg3[%84, %c0_27] : memref<64x128xf32, #tpu.memory_space<vmem>>, vector<1x128xf32>
      %86 = vector.shape_cast %85 : vector<1x128xf32> to vector<128xf32>
      %87 = arith.index_cast %arg7 : i32 to index
      %88 = arith.index_cast %c3_i32 : i32 to index
      %c0_28 = arith.constant 0 : index
      %89 = vector.load %arg6[%87, %88, %c0_28] : memref<8x12x128xf32, #tpu.memory_space<vmem>>, vector<1x1x128xf32>
      %90 = vector.shape_cast %89 : vector<1x1x128xf32> to vector<128xf32>
      %91 = vector.shape_cast %86 : vector<128xf32> to vector<1x1x128xf32>
      tpu.vector_store %arg6[%87, %88, %c0_28], %91 {strides = array<i32>} : memref<8x12x128xf32, #tpu.memory_space<vmem>>, vector<1x1x128xf32>,
      %c4_i32_29 = arith.constant 4 : i32
      %92 = arith.addi %0, %arg7 : i32
      %c12_i32_30 = arith.constant 12 : i32
      %93 = arith.muli %92, %c12_i32_30 : i32
      %94 = arith.addi %93, %c4_i32_29 : i32
      %95 = arith.index_cast %94 : i32 to index
      %96 = memref.load %arg2[%95] : memref<96xi32, #tpu.memory_space<smem>>
      %97 = arith.index_cast %96 : i32 to index
      %c0_31 = arith.constant 0 : index
      %98 = vector.load %arg3[%97, %c0_31] : memref<64x128xf32, #tpu.memory_space<vmem>>, vector<1x128xf32>
      %99 = vector.shape_cast %98 : vector<1x128xf32> to vector<128xf32>
      %100 = arith.index_cast %arg7 : i32 to index
      %101 = arith.index_cast %c4_i32_29 : i32 to index
      %c0_32 = arith.constant 0 : index
      %102 = vector.load %arg6[%100, %101, %c0_32] : memref<8x12x128xf32, #tpu.memory_space<vmem>>, vector<1x1x128xf32>
      %103 = vector.shape_cast %102 : vector<1x1x128xf32> to vector<128xf32>
      %104 = vector.shape_cast %99 : vector<128xf32> to vector<1x1x128xf32>
      tpu.vector_store %arg6[%100, %101, %c0_32], %104 {strides = array<i32>} : memref<8x12x128xf32, #tpu.memory_space<vmem>>, vector<1x1x128xf32>,
      %c5_i32 = arith.constant 5 : i32
      %105 = arith.addi %0, %arg7 : i32
      %c12_i32_33 = arith.constant 12 : i32
      %106 = arith.muli %105, %c12_i32_33 : i32
      %107 = arith.addi %106, %c5_i32 : i32
      %108 = arith.index_cast %107 : i32 to index
      %109 = memref.load %arg2[%108] : memref<96xi32, #tpu.memory_space<smem>>
      %110 = arith.index_cast %109 : i32 to index
      %c0_34 = arith.constant 0 : index
      %111 = vector.load %arg3[%110, %c0_34] : memref<64x128xf32, #tpu.memory_space<vmem>>, vector<1x128xf32>
      %112 = vector.shape_cast %111 : vector<1x128xf32> to vector<128xf32>
      %113 = arith.index_cast %arg7 : i32 to index
      %114 = arith.index_cast %c5_i32 : i32 to index
      %c0_35 = arith.constant 0 : index
      %115 = vector.load %arg6[%113, %114, %c0_35] : memref<8x12x128xf32, #tpu.memory_space<vmem>>, vector<1x1x128xf32>
      %116 = vector.shape_cast %115 : vector<1x1x128xf32> to vector<128xf32>
      %117 = vector.shape_cast %112 : vector<128xf32> to vector<1x1x128xf32>
      tpu.vector_store %arg6[%113, %114, %c0_35], %117 {strides = array<i32>} : memref<8x12x128xf32, #tpu.memory_space<vmem>>, vector<1x1x128xf32>,
      %c6_i32 = arith.constant 6 : i32
      %118 = arith.addi %0, %arg7 : i32
      %c12_i32_36 = arith.constant 12 : i32
      %119 = arith.muli %118, %c12_i32_36 : i32
      %120 = arith.addi %119, %c6_i32 : i32
      %121 = arith.index_cast %120 : i32 to index
      %122 = memref.load %arg2[%121] : memref<96xi32, #tpu.memory_space<smem>>
      %123 = arith.index_cast %122 : i32 to index
      %c0_37 = arith.constant 0 : index
      %124 = vector.load %arg3[%123, %c0_37] : memref<64x128xf32, #tpu.memory_space<vmem>>, vector<1x128xf32>
      %125 = vector.shape_cast %124 : vector<1x128xf32> to vector<128xf32>
      %126 = arith.index_cast %arg7 : i32 to index
      %127 = arith.index_cast %c6_i32 : i32 to index
      %c0_38 = arith.constant 0 : index
      %128 = vector.load %arg6[%126, %127, %c0_38] : memref<8x12x128xf32, #tpu.memory_space<vmem>>, vector<1x1x128xf32>
      %129 = vector.shape_cast %128 : vector<1x1x128xf32> to vector<128xf32>
      %130 = vector.shape_cast %125 : vector<128xf32> to vector<1x1x128xf32>
      tpu.vector_store %arg6[%126, %127, %c0_38], %130 {strides = array<i32>} : memref<8x12x128xf32, #tpu.memory_space<vmem>>, vector<1x1x128xf32>,
      %c7_i32 = arith.constant 7 : i32
      %131 = arith.addi %0, %arg7 : i32
      %c12_i32_39 = arith.constant 12 : i32
      %132 = arith.muli %131, %c12_i32_39 : i32
      %133 = arith.addi %132, %c7_i32 : i32
      %134 = arith.index_cast %133 : i32 to index
      %135 = memref.load %arg2[%134] : memref<96xi32, #tpu.memory_space<smem>>
      %136 = arith.index_cast %135 : i32 to index
      %c0_40 = arith.constant 0 : index
      %137 = vector.load %arg3[%136, %c0_40] : memref<64x128xf32, #tpu.memory_space<vmem>>, vector<1x128xf32>
      %138 = vector.shape_cast %137 : vector<1x128xf32> to vector<128xf32>
      %139 = arith.index_cast %arg7 : i32 to index
      %140 = arith.index_cast %c7_i32 : i32 to index
      %c0_41 = arith.constant 0 : index
      %141 = vector.load %arg6[%139, %140, %c0_41] : memref<8x12x128xf32, #tpu.memory_space<vmem>>, vector<1x1x128xf32>
      %142 = vector.shape_cast %141 : vector<1x1x128xf32> to vector<128xf32>
      %143 = vector.shape_cast %138 : vector<128xf32> to vector<1x1x128xf32>
      tpu.vector_store %arg6[%139, %140, %c0_41], %143 {strides = array<i32>} : memref<8x12x128xf32, #tpu.memory_space<vmem>>, vector<1x1x128xf32>,
      %c8_i32_42 = arith.constant 8 : i32
      %144 = arith.addi %0, %arg7 : i32
      %c12_i32_43 = arith.constant 12 : i32
      %145 = arith.muli %144, %c12_i32_43 : i32
      %146 = arith.addi %145, %c8_i32_42 : i32
      %147 = arith.index_cast %146 : i32 to index
      %148 = memref.load %arg2[%147] : memref<96xi32, #tpu.memory_space<smem>>
      %149 = arith.index_cast %148 : i32 to index
      %c0_44 = arith.constant 0 : index
      %150 = vector.load %arg3[%149, %c0_44] : memref<64x128xf32, #tpu.memory_space<vmem>>, vector<1x128xf32>
      %151 = vector.shape_cast %150 : vector<1x128xf32> to vector<128xf32>
      %152 = arith.index_cast %arg7 : i32 to index
      %153 = arith.index_cast %c8_i32_42 : i32 to index
      %c0_45 = arith.constant 0 : index
      %154 = vector.load %arg6[%152, %153, %c0_45] : memref<8x12x128xf32, #tpu.memory_space<vmem>>, vector<1x1x128xf32>
      %155 = vector.shape_cast %154 : vector<1x1x128xf32> to vector<128xf32>
      %156 = vector.shape_cast %151 : vector<128xf32> to vector<1x1x128xf32>
      tpu.vector_store %arg6[%152, %153, %c0_45], %156 {strides = array<i32>} : memref<8x12x128xf32, #tpu.memory_space<vmem>>, vector<1x1x128xf32>,
      %c9_i32 = arith.constant 9 : i32
      %157 = arith.addi %0, %arg7 : i32
      %c12_i32_46 = arith.constant 12 : i32
      %158 = arith.muli %157, %c12_i32_46 : i32
      %159 = arith.addi %158, %c9_i32 : i32
      %160 = arith.index_cast %159 : i32 to index
      %161 = memref.load %arg2[%160] : memref<96xi32, #tpu.memory_space<smem>>
      %162 = arith.index_cast %161 : i32 to index
      %c0_47 = arith.constant 0 : index
      %163 = vector.load %arg3[%162, %c0_47] : memref<64x128xf32, #tpu.memory_space<vmem>>, vector<1x128xf32>
      %164 = vector.shape_cast %163 : vector<1x128xf32> to vector<128xf32>
      %165 = arith.index_cast %arg7 : i32 to index
      %166 = arith.index_cast %c9_i32 : i32 to index
      %c0_48 = arith.constant 0 : index
      %167 = vector.load %arg6[%165, %166, %c0_48] : memref<8x12x128xf32, #tpu.memory_space<vmem>>, vector<1x1x128xf32>
      %168 = vector.shape_cast %167 : vector<1x1x128xf32> to vector<128xf32>
      %169 = vector.shape_cast %164 : vector<128xf32> to vector<1x1x128xf32>
      tpu.vector_store %arg6[%165, %166, %c0_48], %169 {strides = array<i32>} : memref<8x12x128xf32, #tpu.memory_space<vmem>>, vector<1x1x128xf32>,
      %c10_i32 = arith.constant 10 : i32
      %170 = arith.addi %0, %arg7 : i32
      %c12_i32_49 = arith.constant 12 : i32
      %171 = arith.muli %170, %c12_i32_49 : i32
      %172 = arith.addi %171, %c10_i32 : i32
      %173 = arith.index_cast %172 : i32 to index
      %174 = memref.load %arg2[%173] : memref<96xi32, #tpu.memory_space<smem>>
      %175 = arith.index_cast %174 : i32 to index
      %c0_50 = arith.constant 0 : index
      %176 = vector.load %arg3[%175, %c0_50] : memref<64x128xf32, #tpu.memory_space<vmem>>, vector<1x128xf32>
      %177 = vector.shape_cast %176 : vector<1x128xf32> to vector<128xf32>
      %178 = arith.index_cast %arg7 : i32 to index
      %179 = arith.index_cast %c10_i32 : i32 to index
      %c0_51 = arith.constant 0 : index
      %180 = vector.load %arg6[%178, %179, %c0_51] : memref<8x12x128xf32, #tpu.memory_space<vmem>>, vector<1x1x128xf32>
      %181 = vector.shape_cast %180 : vector<1x1x128xf32> to vector<128xf32>
      %182 = vector.shape_cast %177 : vector<128xf32> to vector<1x1x128xf32>
      tpu.vector_store %arg6[%178, %179, %c0_51], %182 {strides = array<i32>} : memref<8x12x128xf32, #tpu.memory_space<vmem>>, vector<1x1x128xf32>,
      %c11_i32 = arith.constant 11 : i32
      %183 = arith.addi %0, %arg7 : i32
      %c12_i32_52 = arith.constant 12 : i32
      %184 = arith.muli %183, %c12_i32_52 : i32
      %185 = arith.addi %184, %c11_i32 : i32
      %186 = arith.index_cast %185 : i32 to index
      %187 = memref.load %arg2[%186] : memref<96xi32, #tpu.memory_space<smem>>
      %188 = arith.index_cast %187 : i32 to index
      %c0_53 = arith.constant 0 : index
      %189 = vector.load %arg3[%188, %c0_53] : memref<64x128xf32, #tpu.memory_space<vmem>>, vector<1x128xf32>
      %190 = vector.shape_cast %189 : vector<1x128xf32> to vector<128xf32>
      %191 = arith.index_cast %arg7 : i32 to index
      %192 = arith.index_cast %c11_i32 : i32 to index
      %c0_54 = arith.constant 0 : index
      %193 = vector.load %arg6[%191, %192, %c0_54] : memref<8x12x128xf32, #tpu.memory_space<vmem>>, vector<1x1x128xf32>
      %194 = vector.shape_cast %193 : vector<1x1x128xf32> to vector<128xf32>
      %195 = vector.shape_cast %190 : vector<128xf32> to vector<1x1x128xf32>
      tpu.vector_store %arg6[%191, %192, %c0_54], %195 {strides = array<i32>} : memref<8x12x128xf32, #tpu.memory_space<vmem>>, vector<1x1x128xf32>,
      %c12_i32_55 = arith.constant 12 : i32
    }
    %c8_i32_1 = arith.constant 8 : i32
    %c0 = arith.constant 0 : index
    %c0_2 = arith.constant 0 : index
    %2 = vector.load %arg5[%c0, %c0_2] : memref<8x128xf32, #tpu.memory_space<vmem>>, vector<8x128xf32>
    %c0_3 = arith.constant 0 : index
    %c0_4 = arith.constant 0 : index
    %c0_5 = arith.constant 0 : index
    %3 = vector.load %arg6[%c0_3, %c0_4, %c0_5] : memref<8x12x128xf32, #tpu.memory_space<vmem>>, vector<8x12x128xf32>
    %4 = vector.shape_cast %2 : vector<8x128xf32> to vector<8x1x128xf32>
    %5 = vector.broadcast %4 : vector<8x1x128xf32> to vector<8x12x128xf32>
    %6 = arith.mulf %3, %5 : vector<8x12x128xf32>
    %cst = arith.constant dense<0.000000e+00> : vector<8x12xf32>
    %7 = vector.multi_reduction <add>, %6, %cst [2] : vector<8x12x128xf32> to vector<8x12xf32>
    %8 = tpu.iota {dimensions = array<i32: 1>} : vector<8x12xi32>
    %c4_i32 = arith.constant 4 : i32
    %9 = vector.broadcast %c4_i32 : i32 to vector<8x12xi32>
    %10 = arith.cmpi slt, %8, %9 : vector<8x12xi32>
    %cst_6 = arith.constant 1.000000e+00 : f32
    %cst_7 = arith.constant -1.000000e+00 : f32
    %11 = vector.broadcast %cst_6 : f32 to vector<8x12xf32>
    %12 = vector.broadcast %cst_7 : f32 to vector<8x12xf32>
    %13 = arith.select %10, %11, %12 : vector<8x12xi1>, vector<8x12xf32>
    %14 = arith.mulf %7, %13 : vector<8x12xf32>
    %cst_8 = arith.constant 0.000000e+00 : f32
    %15 = vector.broadcast %cst_8 : f32 to vector<8x12xf32>
    %16 = arith.minimumf %14, %15 : vector<8x12xf32>
    %17 = math.absf %14 : vector<8x12xf32>
    %cst_9 = arith.constant 0.000000e+00 : f32
    %18 = vector.broadcast %cst_9 : f32 to vector<8x12xf32>
    %19 = arith.subf %18, %17 : vector<8x12xf32>
    %20 = math.exp %19 : vector<8x12xf32>
    %21 = math.log1p %20 : vector<8x12xf32>
    %22 = arith.subf %16, %21 : vector<8x12xf32>
    %cst_10 = arith.constant dense<0.000000e+00> : vector<8xf32>
    %23 = vector.multi_reduction <add>, %22, %cst_10 [1] : vector<8x12xf32> to vector<8xf32>
    %24 = vector.shape_cast %23 : vector<8xf32> to vector<8x1xf32>
    %cst_11 = arith.constant 0.000000e+00 : f32
    %25 = vector.broadcast %cst_11 : f32 to vector<8x1xf32>
    %26 = arith.subf %25, %24 : vector<8x1xf32>
    %27 = vector.shape_cast %26 : vector<8x1xf32> to vector<8x1xf32>
    %28 = vector.broadcast %27 : vector<8x1xf32> to vector<8x128xf32>
    %c0_12 = arith.constant 0 : index
    %c0_13 = arith.constant 0 : index
    %29 = vector.load %arg4[%c0_12, %c0_13] : memref<8x128xf32, #tpu.memory_space<vmem>>, vector<8x128xf32>
    tpu.vector_store %arg4[%c0_12, %c0_13], %28 {strides = array<i32>} : memref<8x128xf32, #tpu.memory_space<vmem>>, vector<8x128xf32>,
    return
  }
  func.func @transform_0(%arg0: i32, %arg1: memref<8xi32, #tpu.memory_space<smem>>, %arg2: memref<96xi32, #tpu.memory_space<smem>>) -> (i32, i32) {
    %c0_i32 = arith.constant 0 : i32
    %c0_i32_0 = arith.constant 0 : i32
    %c0_i32_1 = arith.constant 0 : i32
    return %c0_i32, %c0_i32_0 : i32, i32
  }
  func.func @transform_1(%arg0: i32, %arg1: memref<8xi32, #tpu.memory_space<smem>>, %arg2: memref<96xi32, #tpu.memory_space<smem>>) -> (i32, i32) {
    %c0_i32 = arith.constant 0 : i32
    %c0_i32_0 = arith.constant 0 : i32
    return %arg0, %c0_i32 : i32, i32
  }
}

</mosaic_0001>

<bundles_post_ra>
// kernel: tpu_custom_call.1
= control target key start
LH: loop header
LB: loop body
LE: loop exit
PB: predicated region body
PF: predicated region fallthrough
CT: control target
= control target key end

     0   :  { %s809_s18 = smov [#allocation5]   ;;  %s810_s19 = smov [#allocation6]   ;;  %s1092_s0 = inlined_call_operand.hbm [shape: s32[8], index: 0, kind: input, shape index: {}]   ;;  %s1093_s2 = inlined_call_operand.hbm [shape: f32[64,128], index: 2, kind: input, shape index: {}]   ;;  %s1094_s3 = inlined_call_operand.hbm [shape: f32[8,128], index: 3, kind: output, shape index: {}]   ;;  %s1095_s1 = inlined_call_operand.hbm [shape: s32[96], index: 1, kind: input, shape index: {}]  }
   0x1   :  { %s9_s14 = sshll.u32 %s1092_s0, 4  ;;  %s14_s17 = sshll.u32 %s1095_s1, 4  ;;  %s10_s14 = int_to_ptr.hbm [resolvable:$true] %s9_s14  ;;  %s15_s17 = int_to_ptr.hbm [resolvable:$true] %s14_s17 }
   0x2   :  { %12 = dma.hbm_to_smem %s10_s14, 16, %s809_s18, [#allocation4] }
   0x3   :  { %17 = dma.hbm_to_smem %s15_s17, 16, %s810_s19, [#allocation4] }
   0x4   :  { %799 = dma.done.wait [#allocation4], 32 }
   0x5   :  { %800 = vsyncadd [#allocation4], 4294967264 }
   0x6   :  { %20 = sfence }
   0x7   :  { %21 = vsyncpa [#allocation8], 0 }
   0x8   :  { %22 = vsyncpa [#allocation9], 0  ;;  %s27_s22 = sshll.u32 %s1093_s2, 4  ;;  %s811_s0 = smov [#allocation7]   ;;  %s28_s22 = int_to_ptr.hbm [resolvable:$true] %s27_s22 }
   0x9   :  { %s29_s23 = sshll.u32 %s811_s0, 4  ;;  %s812_s1 = smov 128   ;;  %s30_s23 = int_to_ptr.vmem [resolvable:$true] %s29_s23 }
   0xa   :  { %s813_s24 = smov 8  }
   0xb   :  { %35 = dma.hbm_to_vmem [thread:$0]  %s28_s22, 1024, %s30_s23, [#allocation8], %s812_s1, %s812_s1, %s813_s24  }
   0xc   :  { %801 = dma.done.wait [#allocation8], 1024  }
   0xd   :  { %802 = vsyncadd [#allocation8], 4294966272  ;;  %s846_s25 = smov 0  }
   0xe LB: > { %s48_s2 = sld [smem:[#allocation5 + %s807_s25]]  ;;  %s853_s26 = smul.u32 12, %s807_s25  ;;  %s807_s25 = sphi %s846_s25, %s46_s25  }
   0xf   : > { %s637_s27 = sshll.u32 %s807_s25, 4  ;;  %s51_s11 = scalar_lea.vmem [#allocation2], %s807_s25 }
  0x10   : > { %s54_s28 = sld [smem:[#allocation6 + %s853_s26]]  ;;  %s60_s29 = sadd.s32 1, %s853_s26 }
  0x11   : > { %s61_s30 = sld [smem:[#allocation6 + %s60_s29]]  ;;  %s65_s4 = sadd.s32 2, %s853_s26 }
  0x12   : > { %s66_s5 = sld [smem:[#allocation6 + %s65_s4]]  ;;  %s70_s6 = sadd.s32 3, %s853_s26 }
  0x13   : > { %s71_s7 = sld [smem:[#allocation6 + %s70_s6]]  ;;  %s75_s9 = sadd.s32 4, %s853_s26 }
  0x14   : > { %s49_s8 = scalar_lea.vmem [#allocation7], %s48_s2  ;;  %s80_s10 = sadd.s32 5, %s853_s26 }
  0x15   : > { %v50_v0 = vld [vmem:[%s49_s8] sm:$0x1]  ;;  %s76_s12 = sld [smem:[#allocation6 + %s75_s9]]  ;;  %s85_s13 = sadd.s32 6, %s853_s26 }
  0x16   : > { %52 = vst [vmem:[%s51_s11] sm:$0x1] %v50_v0  ;;  %s81_s14 = sld [smem:[#allocation6 + %s80_s10]]  ;;  %s55_s15 = scalar_lea.vmem [#allocation7], %s54_s28 }
  0x17   : > { %v56_v1 = vld [vmem:[%s55_s15] sm:$0x1]  ;;  %s86_s16 = sld [smem:[#allocation6 + %s85_s13]]  ;;  %s864_s17 = scalar_lea.vmem [#allocation3], %s637_s27 }
  0x18   : > { %59 = vst [vmem:[%s864_s17] sm:$0x1] %v56_v1  ;;  %s62_s18 = scalar_lea.vmem [#allocation7], %s61_s30  ;;  %s90_s19 = sadd.s32 7, %s853_s26 }
  0x19   : > { %v63_v2 = vld [vmem:[%s62_s18] sm:$0x1]  ;;  %s67_s20 = scalar_lea.vmem [#allocation7], %s66_s5  ;;  %s91_s21 = sld [smem:[#allocation6 + %s90_s19]] }
  0x1a   : > { %64 = vst [vmem:[%s864_s17 + $0x1] sm:$0x1] %v63_v2  ;;  %v68_v3 = vld [vmem:[%s67_s20] sm:$0x1]  ;;  %s72_s22 = scalar_lea.vmem [#allocation7], %s71_s7  ;;  %s95_s0 = sadd.s32 8, %s853_s26 }
  0x1b   : > { %69 = vst [vmem:[%s864_s17 + $0x2] sm:$0x1] %v68_v3  ;;  %v73_v4 = vld [vmem:[%s72_s22] sm:$0x1]  ;;  %s100_s23 = sadd.s32 9, %s853_s26  ;;  %s96_s1 = sld [smem:[#allocation6 + %s95_s0]] }
  0x1c   : > { %74 = vst [vmem:[%s864_s17 + $0x3] sm:$0x1] %v73_v4  ;;  %s77_s24 = scalar_lea.vmem [#allocation7], %s76_s12  ;;  %s101_s2 = sld [smem:[#allocation6 + %s100_s23]] }
  0x1d   : > { %v78_v5 = vld [vmem:[%s77_s24] sm:$0x1]  ;;  %s82_s27 = scalar_lea.vmem [#allocation7], %s81_s14  ;;  %s105_s28 = sadd.s32 10, %s853_s26 }
  0x1e   : > { %79 = vst [vmem:[%s864_s17 + $0x4] sm:$0x1] %v78_v5  ;;  %v83_v6 = vld [vmem:[%s82_s27] sm:$0x1]  ;;  %s87_s29 = scalar_lea.vmem [#allocation7], %s86_s16  ;;  %s106_s30 = sld [smem:[#allocation6 + %s105_s28]] }
  0x1f   : > { %84 = vst [vmem:[%s864_s17 + $0x5] sm:$0x1] %v83_v6  ;;  %v88_v7 = vld [vmem:[%s87_s29] sm:$0x1]  ;;  %s110_s4 = sadd.s32 11, %s853_s26  ;;  %s92_s6 = scalar_lea.vmem [#allocation7], %s91_s21 }
  0x20   : > { %89 = vst [vmem:[%s864_s17 + $0x6] sm:$0x1] %v88_v7  ;;  %s111_s5 = sld [smem:[#allocation6 + %s110_s4]]  ;;  %v93_v8 = vld [vmem:[%s92_s6] sm:$0x1]  ;;  %s46_s25 = sadd.s32 1, %s807_s25  }
  0x21   : > { %94 = vst [vmem:[%s864_s17 + $0x7] sm:$0x1] %v93_v8  ;;  %s97_s7 = scalar_lea.vmem [#allocation7], %s96_s1  ;;  %p43_p0 = scmp.ge.s32.totalorder %s46_s25, 8  }
  0x22   : > { %v98_v9 = vld [vmem:[%s97_s7] sm:$0x1]  ;;  %s102_s8 = scalar_lea.vmem [#allocation7], %s101_s2  ;;  %v213_v15 = vlaneseq (%p43_p0)  ;;  %vm174_vm0 = vcmask (%p43_p0), 1043456   ;;  %v814_v46 = vmov (%p43_p0), -1.0   ;;  %s816_s25 = smov (%p43_p0), [#allocation10]  }
  0x23   : > { %99 = vst [vmem:[%s864_s17 + $0x8] sm:$0x1] %v98_v9  ;;  %v103_v10 = vld [vmem:[%s102_s8] sm:$0x1]  ;;  %s604_s26 = sshll.u32 (%p43_p0), %s816_s25, 4  ;;  %s606_s13 = sshll.u32 (%p43_p0), %s1094_s3, 4  ;;  %s605_s26 = int_to_ptr.vmem [resolvable:$true] %s604_s26  ;;  %s607_s13 = int_to_ptr.hbm [resolvable:$true] %s606_s13 }
  0x24   : > { %104 = vst [vmem:[%s864_s17 + $0x9] sm:$0x1] %v103_v10  ;;  %s107_s9 = scalar_lea.vmem [#allocation7], %s106_s30  ;;  %45 = sbr.rel (!%p43_p0) target bundleno = 14 (0xe), region = 50  ;;  %v886_v13 = vld [vmem:[#allocation2] sm:$0xff] (%p43_p0)  ;;  %v219_v25 = vshrl.u32 (%p43_p0), %v213_v15, 7 }
  0x25   : > { %v108_v11 = vld [vmem:[%s107_s9] sm:$0x1]  ;;  %v140_v16 = vperm.slane (%p43_p0), %v886_v13, 0  ;;  %v134_v17 = vrot.slane (%p43_p0), %v886_v13, 2  ;;  %v133_v18 = vrot.slane (%p43_p0), %v886_v13, 1  ;;  %v135_v35 = vrot.slane (%p43_p0), %v886_v13, 3 }
  0x26   : > { %109 = vst [vmem:[%s864_s17 + $0xa] sm:$0x1] %v108_v11  ;;  %s112_s10 = scalar_lea.vmem [#allocation7], %s111_s5  ;;  %654 = vset.pattern.permute.xlu0 (%p43_p0), %v219_v25  ;;  %v226_v31 = vadd.s32 (%p43_p0), 8, %v219_v25  ;;  %v895_v42 = vand.u32 (%p43_p0), 127, %v213_v15  ;;  %v136_v44 = vrot.slane (%p43_p0), %v886_v13, 4 }
  0x27   : > { %v113_v12 = vld [vmem:[%s112_s10] sm:$0x1]  ;;  %v142_v22 = vperm.slane (%p43_p0), %v134_v17, 0  ;;  %v141_v23 = vperm.slane (%p43_p0), %v133_v18, 0  ;;  %v143_v38 = vperm.slane (%p43_p0), %v135_v35, 0  ;;  %v139_v52 = vrot.slane (%p43_p0), %v886_v13, 7 }
  0x28   : > { %114 = vst [vmem:[%s864_s17 + $0xb] sm:$0x1] %v113_v12  ;;  %655 = vset.pattern.permute.xlu1 (%p43_p0), %v226_v31  ;;  %vm215_vm1 = vcmp.lt.s32.totalorder (%p43_p0), %v895_v42, 4  ;;  %v144_v48 = vperm.slane (%p43_p0), %v136_v44, 0  ;;  %v137_v54 = vrot.slane (%p43_p0), %v886_v13, 5  ;;  %v138_v63 = vrot.slane (%p43_p0), %v886_v13, 6 }
  0x29   :  { %v216_v47 = vsel %vm215_vm1, 1.0, %v814_v46  ;;  %v147_v55 = vperm.slane %v139_v52, 0  ;;  %v815_v17 = vmov 0  }
  0x2a   :  { %v145_v58 = vperm.slane %v137_v54, 0  ;;  %v146_v1 = vperm.slane %v138_v63, 0  ;;  %656 = vset.pattern.permute.xlu2 %v815_v17 }
  0x2f   :  { %v116_v14 = vld [vmem:[#allocation3] sm:$0xff]  ;;  %v118_v20 = vld [vmem:[#allocation3 + $0x10] sm:$0xff]  ;;  %v117_v24 = vld [vmem:[#allocation3 + $0x8] sm:$0xf] }
  0x30   :  { %v120_v19 = vld [vmem:[#allocation3 + $0x20] sm:$0xff]  ;;  %v156_v21 = vmul.f32 %v140_v16, %v116_v14  ;;  %v158_v27 = vmul.f32 %v141_v23, %v118_v20  ;;  %v121_v28 = vld [vmem:[#allocation3 + $0x28] sm:$0xf]  ;;  %v119_v29 = vld [vmem:[#allocation3 + $0x18] sm:$0xf]  ;;  %v157_v30 = vmul.f32 %v140_v16, %v117_v24 }
  0x31   :  { %v160_v26 = vmul.f32 %v142_v22, %v120_v19  ;;  %v161_v32 = vmul.f32 %v142_v22, %v121_v28  ;;  %v159_v33 = vmul.f32 %v141_v23, %v119_v29  ;;  %v122_v39 = vld [vmem:[#allocation3 + $0x30] sm:$0xff]  ;;  %v123_v41 = vld [vmem:[#allocation3 + $0x38] sm:$0xf]  ;;  %v124_v49 = vld [vmem:[#allocation3 + $0x40] sm:$0xff] }
  0x32   :  { %172 = vadd.xlane.f32.xlu0 %v156_v21  ;;  %178 = vadd.xlane.f32.xlu1 %v158_v27  ;;  %v175_v34 = vsel %vm174_vm0, %v157_v30, 0.0  ;;  %v162_v40 = vmul.f32 %v143_v38, %v122_v39  ;;  %v163_v43 = vmul.f32 %v143_v38, %v123_v41  ;;  %v164_v50 = vmul.f32 %v144_v48, %v124_v49  ;;  %v125_v51 = vld [vmem:[#allocation3 + $0x48] sm:$0xf]  ;;  %v131_v56 = vld [vmem:[#allocation3 + $0x78] sm:$0xf]  ;;  %v130_v5 = vld [vmem:[#allocation3 + $0x70] sm:$0xff] }
  0x33   :  { %183 = vadd.xlane.f32.xlu2 %v160_v26  ;;  %v185_v36 = vsel %vm174_vm0, %v161_v32, 0.0  ;;  %v180_v37 = vsel %vm174_vm0, %v159_v33, 0.0  ;;  %v165_v53 = vmul.f32 %v144_v48, %v125_v51  ;;  %v171_v59 = vmul.f32 %v147_v55, %v131_v56  ;;  %v127_v60 = vld [vmem:[#allocation3 + $0x58] sm:$0xf]  ;;  %v129_v2 = vld [vmem:[#allocation3 + $0x68] sm:$0xf] }
  0x34   :  { %v190_v45 = vsel %vm174_vm0, %v163_v43, 0.0  ;;  %v167_v62 = vmul.f32 %v145_v58, %v127_v60  ;;  %v169_v3 = vmul.f32 %v146_v1, %v129_v2  ;;  %v170_v6 = vmul.f32 %v147_v55, %v130_v5  ;;  %v128_v7 = vld [vmem:[#allocation3 + $0x60] sm:$0xff]  ;;  %v126_v9 = vld [vmem:[#allocation3 + $0x50] sm:$0xff] }
  0x35   :  { %v195_v57 = vsel %vm174_vm0, %v165_v53, 0.0  ;;  %v210_v61 = vsel %vm174_vm0, %v171_v59, 0.0  ;;  %v168_v8 = vmul.f32 %v146_v1, %v128_v7  ;;  %v166_v10 = vmul.f32 %v145_v58, %v126_v9 }
  0x36   :  { %v200_v0 = vsel %vm174_vm0, %v167_v62, 0.0  ;;  %v205_v4 = vsel %vm174_vm0, %v169_v3, 0.0 }
  0x3a   :  { %176 = vadd.xlane.f32.xlu0 %v175_v34  ;;  %181 = vadd.xlane.f32.xlu1 %v180_v37 }
  0x3b   :  { %186 = vadd.xlane.f32.xlu2 %v185_v36 }
  0x43   :  { %188 = vadd.xlane.f32.xlu2 %v162_v40 }
  0x4b   :  { %191 = vadd.xlane.f32.xlu2 %v190_v45 }
  0x4e   :  { %222 = vperm.xlu0 %654, %v216_v47  }
  0x53   :  { %193 = vadd.xlane.f32.xlu2 %v164_v50  ;;  %228 = vperm.xlu1 %655, %v216_v47  }
  0x56   :  { %657 = vset.pattern.permute.xlu0 %v815_v17 }
  0x5b   :  { %196 = vadd.xlane.f32.xlu2 %v195_v57  ;;  %658 = vset.pattern.permute.xlu1 %v815_v17 }
  0x63   :  { %201 = vadd.xlane.f32.xlu2 %v200_v0 }
  0x6b   :  { %206 = vadd.xlane.f32.xlu2 %v205_v4 }
  0x73   :  { %208 = vadd.xlane.f32.xlu2 %v170_v6 }
  0x78   :  { %203 = vadd.xlane.f32.xlu0 %v168_v8 }
  0x7b   :  { %211 = vadd.xlane.f32.xlu2 %v210_v61 }
  0x7d   :  { %198 = vadd.xlane.f32.xlu1 %v166_v10 }
  0xa5   :  { %v173_v12 = vpop.xlane.xlu0 %172  ;;  %v179_v14 = vpop.xlane.xlu1 %178 }
  0xa6   :  { %v184_v11 = vpop.xlane.xlu2 %183 }
  0xad   :  { %v907_v15 = vpop.xlane.xlu0 %176  ;;  %v182_v18 = vpop.xlane.xlu1 %181 }
  0xae   :  { %v187_v13 = vpop.xlane.xlu2 %186 }
  0xb6   :  { %v189_v16 = vpop.xlane.xlu2 %188 }
  0xbe   :  { %v192_v19 = vpop.xlane.xlu2 %191 }
  0xc0   :  { %v909_v20 = vpop.permute.xlu0 %222 }
  0xc1   :  { %v912_v21 = vmul.f32 %v909_v20, %v173_v12  ;;  %v915_v22 = vmul.f32 %v909_v20, %v184_v11  ;;  %v918_v23 = vmul.f32 %v909_v20, %v179_v14  ;;  %v921_v24 = vmul.f32 %v909_v20, %v189_v16 }
  0xc3   :  { %v264_v25 = vand.u32 2147483647, %v912_v21  ;;  %v268_v26 = vand.u32 2147483647, %v915_v22  ;;  %v266_v27 = vand.u32 2147483647, %v918_v23 }
  0xc4   :  { %v270_v28 = vand.u32 2147483647, %v921_v24  ;;  %v248_v0 = vmin.f32 %v912_v21, 0.0  ;;  %v252_v5 = vmin.f32 %v915_v22, 0.0  ;;  %v250_v10 = vmin.f32 %v918_v23, 0.0 }
  0xc5   :  { %v280_v29 = vsub.f32 0.0, %v264_v25  ;;  %v284_v30 = vsub.f32 0.0, %v268_v26  ;;  %v282_v31 = vsub.f32 0.0, %v266_v27  ;;  %v927_v34 = vpop.permute.xlu1 %228 }
  0xc6   :  { %v286_v32 = vsub.f32 0.0, %v270_v28  ;;  %v194_v33 = vpop.xlane.xlu2 %193  ;;  %v933_v40 = vmul.f32 %v927_v34, %v182_v18  ;;  %v937_v43 = vmul.f32 %v927_v34, %v187_v13  ;;  %v942_v53 = vmul.f32 %v927_v34, %v192_v19 }
  0xc7   :  { %v296_v35 = vmul.f32 1.442695, %v280_v29  ;;  %v304_v36 = vmul.f32 1.442695, %v284_v30  ;;  %v930_v37 = vmul.f32 %v909_v20, %v194_v33  ;;  %v300_v38 = vmul.f32 1.442695, %v282_v31 }
  0xc8   :  { %v308_v39 = vmul.f32 1.442695, %v286_v32  ;;  %v267_v45 = vand.u32 2147483647, %v933_v40  ;;  %v269_v49 = vand.u32 2147483647, %v937_v43 }
  0xc9   :  { %659 = vpow2.f32 %v296_v35  ;;  %v272_v41 = vand.u32 2147483647, %v930_v37  ;;  %v271_v63 = vand.u32 2147483647, %v942_v53 }
  0xca   :  { %661 = vpow2.f32 %v304_v36  ;;  %v283_v56 = vsub.f32 0.0, %v267_v45  ;;  %v285_v59 = vsub.f32 0.0, %v269_v49 }
  0xcb   :  { %663 = vpow2.f32 %v300_v38  ;;  %v288_v44 = vsub.f32 0.0, %v272_v41  ;;  %v287_v17 = vsub.f32 0.0, %v271_v63  ;;  %v254_v63 = vmin.f32 %v921_v24, 0.0 }
  0xcc   :  { %665 = vpow2.f32 %v308_v39  ;;  %v302_v3 = vmul.f32 1.442695, %v283_v56  ;;  %v306_v11 = vmul.f32 1.442695, %v285_v59 }
  0xcd   :  { %v312_v46 = vmul.f32 1.442695, %v288_v44  ;;  %v310_v35 = vmul.f32 1.442695, %v287_v17  ;;  %v251_v17 = vmin.f32 %v933_v40, 0.0 }
  0xce   :  { %v197_v48 = vpop.xlane.xlu2 %196 }
  0xcf   :  { %v660_v47 = vpop.eup %659  ;;  %667 = vpow2.f32 %v312_v46  ;;  %v951_v13 = vmul.f32 %v927_v34, %v197_v48 }
  0xd0   :  { %v662_v50 = vpop.eup %661  ;;  %v328_v51 = vadd.f32 1.0, %v660_v47  ;;  %v331_v52 = vmul.f32 -0.5, %v660_v47  ;;  %v334_v61 = vand.u32 2147483647, %v660_v47 }
  0xd1   :  { %v664_v54 = vpop.eup %663  ;;  %v364_v55 = vadd.f32 1.0, %v662_v50  ;;  %v367_v58 = vmul.f32 -0.5, %v662_v50  ;;  %v370_v9 = vand.u32 2147483647, %v662_v50  ;;  %v273_v31 = vand.u32 2147483647, %v951_v13 }
  0xd2   :  { %v666_v57 = vpop.eup %665  ;;  %669 = vlog2.f32 %v328_v51  ;;  %v332_v60 = vadd.f32 1.0, %v331_v52  ;;  %v346_v62 = vadd.f32 1.0, %v664_v54  ;;  %v349_v1 = vmul.f32 -0.5, %v664_v54 }
  0xd3   :  { %671 = vlog2.f32 %v364_v55  ;;  %v382_v2 = vadd.f32 1.0, %v666_v57  ;;  %v368_v6 = vadd.f32 1.0, %v367_v58  ;;  %v385_v7 = vmul.f32 -0.5, %v666_v57 }
  0xd4   :  { %673 = vlog2.f32 %v346_v62  ;;  %v333_v14 = vmul.f32 %v660_v47, %v332_v60  ;;  %vm953_vm2 = vcmp.lt.f32.partialorder %v334_v61, 0.0004427343  ;;  %v350_v21 = vadd.f32 1.0, %v349_v1 }
  0xd5   :  { %v946_v4 = vpop.eup %667  ;;  %675 = vlog2.f32 %v382_v2  ;;  %v369_v23 = vmul.f32 %v662_v50, %v368_v6  ;;  %v352_v26 = vand.u32 2147483647, %v664_v54  ;;  %v386_v27 = vadd.f32 1.0, %v385_v7 }
  0xd6   :  { %v202_v8 = vpop.xlane.xlu2 %201  ;;  %677 = vpow2.f32 %v302_v3  ;;  %v400_v22 = vadd.f32 1.0, %v946_v4  ;;  %vm371_vm3 = vcmp.lt.f32.partialorder %v370_v9, 0.0004427343  ;;  %v388_v29 = vand.u32 2147483647, %v666_v57 }
  0xd7   :  { %679 = vpow2.f32 %v306_v11  ;;  %v351_v41 = vmul.f32 %v664_v54, %v350_v21  ;;  %vm353_vm4 = vcmp.lt.f32.partialorder %v352_v26, 0.0004427343  ;;  %v387_v45 = vmul.f32 %v666_v57, %v386_v27 }
  0xd8   :  { %v670_v12 = vpop.eup %669  ;;  %681 = vlog2.f32 %v400_v22  ;;  %v403_v46 = vmul.f32 -0.5, %v946_v4  ;;  %v963_v48 = vmul.f32 %v927_v34, %v202_v8  ;;  %vm965_vm5 = vcmp.lt.f32.partialorder %v388_v29, 0.0004427343 }
  0xd9   :  { %v672_v18 = vpop.eup %671  ;;  %v330_v19 = vmul.f32 0.6931472, %v670_v12  ;;  %v289_v52 = vsub.f32 0.0, %v273_v31  ;;  %683 = vpow2.f32 %v310_v35  ;;  %v979_v8 = vmul.f32 %v927_v34, %v907_v15 }
  0xda   :  { %v366_v25 = vmul.f32 0.6931472, %v672_v18  ;;  %v674_v30 = vpop.eup %673  ;;  %v404_v59 = vadd.f32 1.0, %v403_v46  ;;  %v275_v62 = vand.u32 2147483647, %v963_v48 }
  0xdb   :  { %v336_v28 = vsel %vm953_vm2, %v333_v14, %v330_v19  ;;  %v676_v36 = vpop.eup %675  ;;  %v348_v39 = vmul.f32 0.6931472, %v674_v30  ;;  %v314_v1 = vmul.f32 1.442695, %v289_v52  ;;  %v265_v22 = vand.u32 2147483647, %v979_v8 }
  0xdc   :  { %v472_v32 = vsub.f32 %v248_v0, %v336_v28  ;;  %v372_v33 = vsel %vm371_vm3, %v369_v23, %v366_v25  ;;  %v384_v44 = vmul.f32 0.6931472, %v676_v36  ;;  %v678_v47 = vpop.eup %677  ;;  %v406_v0 = vand.u32 2147483647, %v946_v4 }
  0xdd   :  { %v476_v38 = vsub.f32 %v252_v5, %v372_v33  ;;  %v354_v49 = vsel %vm353_vm4, %v351_v41, %v348_v39  ;;  %v680_v55 = vpop.eup %679  ;;  %v355_v56 = vadd.f32 1.0, %v678_v47  ;;  %v358_v58 = vmul.f32 -0.5, %v678_v47 }
  0xde   :  { %505 = vperm.xlu2 %656, %v472_v32   ;;  %v207_v50 = vpop.xlane.xlu2 %206  ;;  %v474_v54 = vsub.f32 %v250_v10, %v354_v49  ;;  %v390_v57 = vsel %vm965_vm5, %v387_v45, %v384_v44  ;;  %v373_v60 = vadd.f32 1.0, %v680_v55  ;;  %v682_v61 = vpop.eup %681  ;;  %v405_v7 = vmul.f32 %v946_v4, %v404_v59 }
  0xdf   :  { %517 = vperm.xlu1 %658, %v476_v38   ;;  %685 = vlog2.f32 %v355_v56  ;;  %v478_v2 = vsub.f32 %v254_v63, %v390_v57  ;;  %v974_v3 = vpop.eup %683  ;;  %v359_v5 = vadd.f32 1.0, %v358_v58  ;;  %v402_v6 = vmul.f32 0.6931472, %v682_v61 }
  0xe0   :  { %511 = vperm.xlu0 %657, %v474_v54   ;;  %687 = vlog2.f32 %v373_v60  ;;  %v291_v9 = vsub.f32 0.0, %v275_v62  ;;  %v361_v10 = vand.u32 2147483647, %v678_v47  ;;  %vm981_vm6 = vcmp.lt.f32.partialorder %v406_v0, 0.0004427343 }
  0xe1   :  { %689 = vpow2.f32 %v314_v1  ;;  %v376_v14 = vmul.f32 -0.5, %v680_v55  ;;  %v256_v4 = vmin.f32 %v930_v37, 0.0  ;;  %v391_v15 = vadd.f32 1.0, %v974_v3 }
  0xe2   :  { %v360_v19 = vmul.f32 %v678_v47, %v359_v5  ;;  %v408_v21 = vsel %vm981_vm6, %v405_v7, %v402_v6  ;;  %v318_v23 = vmul.f32 1.442695, %v291_v9  ;;  %vm362_vm7 = vcmp.lt.f32.partialorder %v361_v10, 0.0004427343 }
  0xe3   :  { %v377_v40 = vadd.f32 1.0, %v376_v14  ;;  %v480_v30 = vsub.f32 %v256_v4, %v408_v21  ;;  %v379_v31 = vand.u32 2147483647, %v680_v55  ;;  %691 = vlog2.f32 %v391_v15 }
  0xe4   :  { %693 = vpow2.f32 %v318_v23  ;;  %v1002_v36 = vmul.f32 %v927_v34, %v207_v50  ;;  %v281_v41 = vsub.f32 0.0, %v265_v22  ;;  %v394_v47 = vmul.f32 -0.5, %v974_v3 }
  0xe5   :  { %v686_v16 = vpop.eup %685  ;;  %v378_v45 = vmul.f32 %v680_v55, %v377_v40  ;;  %vm1008_vm8 = vcmp.lt.f32.partialorder %v379_v31, 0.0004427343  ;;  %v255_v4 = vmin.f32 %v942_v53, 0.0  ;;  %vm555_vm2 = vcmask 130112  }
  0xe6   :  { %v209_v24 = vpop.xlane.xlu2 %208  ;;  %v357_v18 = vmul.f32 0.6931472, %v686_v16  ;;  %v688_v25 = vpop.eup %687  ;;  %v298_v59 = vmul.f32 1.442695, %v281_v41  ;;  %v277_v60 = vand.u32 2147483647, %v1002_v36 }
  0xe7   :  { %523 = vperm.xlu1 %658, %v478_v2   ;;  %v986_v12 = vmul.f32 %v909_v20, %v209_v24  ;;  %v998_v32 = vpop.eup %689  ;;  %v375_v35 = vmul.f32 0.6931472, %v688_v25  ;;  %v395_v62 = vadd.f32 1.0, %v394_v47  ;;  %v397_v2 = vand.u32 2147483647, %v974_v3 }
  0xe8   :  { %v363_v28 = vsel %vm362_vm7, %v360_v19, %v357_v18  ;;  %v409_v51 = vadd.f32 1.0, %v998_v32  ;;  %v293_v7 = vsub.f32 0.0, %v277_v60  ;;  %vm578_vm3 = vcmask 1041409  }
  0xe9   :  { %v278_v26 = vand.u32 2147483647, %v986_v12  ;;  %v475_v29 = vsub.f32 %v251_v17, %v363_v28  ;;  %v381_v52 = vsel %vm1008_vm8, %v378_v45, %v375_v35  ;;  %v692_v57 = vpop.eup %691  ;;  %v396_v9 = vmul.f32 %v974_v3, %v395_v62 }
  0xea   :  { %v1021_v63 = vpop.eup %693  ;;  %v393_v6 = vmul.f32 0.6931472, %v692_v57  ;;  %vm398_vm9 = vcmp.lt.f32.partialorder %v397_v2, 0.0004427343  ;;  %v322_v15 = vmul.f32 1.442695, %v293_v7 }
  0xeb   :  { %v204_v27 = vpop.xlane.xlu0 %203  ;;  %514 = vperm.xlu2 %656, %v475_v29   ;;  %v294_v38 = vsub.f32 0.0, %v278_v26  ;;  %v427_v10 = vadd.f32 1.0, %v1021_v63  ;;  %v415_v3 = vand.u32 2147483647, %v998_v32  ;;  %vm580_vm4 = vcmask 1042434  }
  0xec   :  { %v996_v37 = vmul.f32 %v909_v20, %v204_v27  ;;  %v399_v14 = vsel %vm398_vm9, %v396_v9, %v393_v6  ;;  %v430_v27 = vmul.f32 -0.5, %v1021_v63  ;;  %vm582_vm5 = vcmask 1043459  }
  0xed   :  { %v324_v55 = vmul.f32 1.442695, %v294_v38  ;;  %v479_v22 = vsub.f32 %v255_v4, %v399_v14  ;;  %vm1036_vm10 = vcmp.lt.f32.partialorder %v415_v3, 0.0004427343  ;;  %vm584_vm6 = vcmask 1044484  }
  0xee   :  { %v276_v33 = vand.u32 2147483647, %v996_v37  ;;  %v212_v39 = vpop.xlane.xlu2 %211  ;;  %v431_v47 = vadd.f32 1.0, %v430_v27  ;;  %vm586_vm7 = vcmask 1045509   ;;  %vm588_vm8 = vcmask 1046534  }
  0xef   :  { %529 = vperm.xlu1 %658, %v480_v30   ;;  %v1005_v46 = vmul.f32 %v927_v34, %v212_v39  ;;  %v253_v34 = vmin.f32 %v937_v43, 0.0  ;;  %v412_v43 = vmul.f32 -0.5, %v998_v32  ;;  %vm590_vm9 = vcmask 1047559  }
  0xf0   :  { %v292_v44 = vsub.f32 0.0, %v276_v33  ;;  %v199_v56 = vpop.xlane.xlu1 %198 }
  0xf1   :  { %v279_v54 = vand.u32 2147483647, %v1005_v46  ;;  %v1018_v58 = vmul.f32 %v909_v20, %v199_v56  ;;  %v477_v0 = vsub.f32 %v253_v34, %v381_v52  ;;  %v413_v18 = vadd.f32 1.0, %v412_v43 }
  0xf2   :  { %v320_v50 = vmul.f32 1.442695, %v292_v44  ;;  %v259_v43 = vmin.f32 %v963_v48, 0.0 }
  0xf3   :  { %v295_v61 = vsub.f32 0.0, %v279_v54  ;;  %v274_v1 = vand.u32 2147483647, %v1018_v58  ;;  %520 = vperm.xlu2 %656, %v477_v0   ;;  %v414_v53 = vmul.f32 %v998_v32, %v413_v18  ;;  %v257_v32 = vmin.f32 %v951_v13, 0.0 }
  0xf4   :  { %695 = vpow2.f32 %v320_v50  ;;  %v260_v54 = vmin.f32 %v996_v37, 0.0  ;;  %v432_v0 = vmul.f32 %v1021_v63, %v431_v47  ;;  %v258_v4 = vmin.f32 %v1018_v58, 0.0 }
  0xf5   :  { %697 = vlog2.f32 %v409_v51  ;;  %v326_v5 = vmul.f32 1.442695, %v295_v61  ;;  %v290_v20 = vsub.f32 0.0, %v274_v1  ;;  %v433_v51 = vand.u32 2147483647, %v1021_v63 }
  0xf6   :  { %699 = vpow2.f32 %v324_v55 }
  0xf7   :  { %701 = vpow2.f32 %v326_v5  ;;  %v316_v24 = vmul.f32 1.442695, %v290_v20  ;;  %vm1051_vm12 = vcmp.lt.f32.partialorder %v433_v51, 0.0004427343 }
  0xf8   :  { %703 = vpow2.f32 %v298_v59 }
  0xf9   :  { %705 = vpow2.f32 %v316_v24  ;;  %v263_v24 = vmin.f32 %v1005_v46, 0.0 }
  0xfa   :  { %v696_v11 = vpop.eup %695  ;;  %707 = vlog2.f32 %v427_v10 }
  0xfb   :  { %v698_v16 = vpop.eup %697  ;;  %v436_v17 = vadd.f32 1.0, %v696_v11  ;;  %v439_v19 = vmul.f32 -0.5, %v696_v11  ;;  %526 = vperm.xlu2 %656, %v479_v22   ;;  %v442_v31 = vand.u32 2147483647, %v696_v11 }
  0xfc   :  { %v1029_v21 = vpop.eup %699  ;;  %v411_v23 = vmul.f32 0.6931472, %v698_v16 }
  0xfd   :  { %709 = vlog2.f32 %v436_v17  ;;  %v702_v25 = vpop.eup %701  ;;  %v440_v40 = vadd.f32 1.0, %v439_v19  ;;  %v454_v33 = vadd.f32 1.0, %v1029_v21  ;;  %vm443_vm11 = vcmp.lt.f32.partialorder %v442_v31, 0.0004427343 }
  0xfe   :  { %v1032_v26 = vpop.eup %703  ;;  %v463_v28 = vadd.f32 1.0, %v702_v25  ;;  %711 = vpow2.f32 %v322_v15  ;;  %v417_v38 = vsel %vm1036_vm10, %v414_v53, %v411_v23  ;;  %v466_v41 = vmul.f32 -0.5, %v702_v25 }
  0xff   :  { %v706_v29 = vpop.eup %705  ;;  %v337_v44 = vadd.f32 1.0, %v1032_v26  ;;  %v441_v52 = vmul.f32 %v696_v11, %v440_v40  ;;  %v481_v56 = vsub.f32 %v257_v32, %v417_v38  ;;  %v469_v62 = vand.u32 2147483647, %v702_v25 }
 0x100   :  { %713 = vlog2.f32 %v463_v28  ;;  %v708_v35 = vpop.eup %707  ;;  %v418_v39 = vadd.f32 1.0, %v706_v29  ;;  %v421_v49 = vmul.f32 -0.5, %v706_v29  ;;  %v467_v59 = vadd.f32 1.0, %v466_v41 }
 0x101   :  { %v429_v55 = vmul.f32 0.6931472, %v708_v35  ;;  %v457_v1 = vmul.f32 -0.5, %v1029_v21  ;;  %v424_v2 = vand.u32 2147483647, %v706_v29  ;;  %v340_v6 = vmul.f32 -0.5, %v1032_v26 }
 0x102   :  { %715 = vlog2.f32 %v418_v39  ;;  %v422_v61 = vadd.f32 1.0, %v421_v49  ;;  %v468_v9 = vmul.f32 %v702_v25, %v467_v59  ;;  %vm470_vm13 = vcmp.lt.f32.partialorder %v469_v62, 0.0004427343 }
 0x103   :  { %v710_v45 = vpop.eup %709  ;;  %717 = vlog2.f32 %v454_v33  ;;  %532 = vperm.xlu2 %656, %v481_v56   ;;  %v435_v7 = vsel %vm1051_vm12, %v432_v0, %v429_v55  ;;  %v458_v17 = vadd.f32 1.0, %v457_v1  ;;  %vm425_vm14 = vcmp.lt.f32.partialorder %v424_v2, 0.0004427343 }
 0x104   :  { %v438_v50 = vmul.f32 0.6931472, %v710_v45  ;;  %v1047_v57 = vpop.eup %711  ;;  %719 = vlog2.f32 %v337_v44  ;;  %v423_v14 = vmul.f32 %v706_v29, %v422_v61  ;;  %v483_v18 = vsub.f32 %v259_v43, %v435_v7 }
 0x105   :  { %v445_v63 = vadd.f32 1.0, %v1047_v57  ;;  %v460_v48 = vand.u32 2147483647, %v1029_v21  ;;  %v341_v22 = vadd.f32 1.0, %v340_v6  ;;  %v343_v23 = vand.u32 2147483647, %v1032_v26 }
 0x106   :  { %v444_v34 = vsel %vm443_vm11, %v441_v52, %v438_v50  ;;  %v714_v60 = vpop.eup %713  ;;  %v459_v28 = vmul.f32 %v1029_v21, %v458_v17  ;;  %v448_v53 = vmul.f32 -0.5, %v1047_v57  ;;  %v262_v29 = vmin.f32 %v986_v12, 0.0 }
 0x107   :  { %v484_v13 = vsub.f32 %v260_v54, %v444_v34  ;;  %v465_v37 = vmul.f32 0.6931472, %v714_v60  ;;  %721 = vlog2.f32 %v445_v63  ;;  %vm461_vm15 = vcmp.lt.f32.partialorder %v460_v48, 0.0004427343 }
 0x108   :  { %v716_v20 = vpop.eup %715  ;;  %v342_v58 = vmul.f32 %v1032_v26, %v341_v22  ;;  %vm344_vm0 = vcmp.lt.f32.partialorder %v343_v23, 0.0004427343  ;;  %v249_v33 = vmin.f32 %v979_v8, 0.0  ;;  %v449_v38 = vadd.f32 1.0, %v448_v53 }
 0x109   :  { %541 = vperm.xlu0 %657, %v484_v13   ;;  %v718_v10 = vpop.eup %717  ;;  %v420_v11 = vmul.f32 0.6931472, %v716_v20  ;;  %v471_v15 = vsel %vm470_vm13, %v468_v9, %v465_v37  ;;  %v451_v21 = vand.u32 2147483647, %v1047_v57  ;;  %v261_v45 = vmin.f32 %v1002_v36, 0.0 }
 0x10a   :  { %v720_v16 = vpop.eup %719  ;;  %v456_v3 = vmul.f32 0.6931472, %v718_v10  ;;  %v487_v46 = vsub.f32 %v263_v24, %v471_v15  ;;  %v450_v26 = vmul.f32 %v1047_v57, %v449_v38  ;;  %v553_v59 = vadd.s32 4294967288, %v895_v42 }
 0x10b   :  { %v426_v19 = vsel %vm425_vm14, %v423_v14, %v420_v11  ;;  %538 = vperm.xlu2 %656, %v483_v18   ;;  %v339_v27 = vmul.f32 0.6931472, %v720_v16  ;;  %vm452_vm1 = vcmp.lt.f32.partialorder %v451_v21, 0.0004427343  ;;  %vm593_vm10 = vcmask 97280  }
 0x10c   :  { %v482_v25 = vsub.f32 %v258_v4, %v426_v19  ;;  %v462_v40 = vsel %vm461_vm15, %v459_v28, %v456_v3 }
 0x10d   :  { %v345_v30 = vsel %vm344_vm0, %v342_v58, %v339_v27  ;;  %v722_v31 = vpop.eup %721  ;;  %v486_v35 = vsub.f32 %v262_v29, %v462_v40 }
 0x10e   :  { %535 = vperm.xlu1 %658, %v482_v25   ;;  %v473_v39 = vsub.f32 %v249_v33, %v345_v30  ;;  %v447_v41 = vmul.f32 0.6931472, %v722_v31 }
 0x110   :  { %v453_v44 = vsel %vm452_vm1, %v450_v26, %v447_v41 }
 0x111   :  { %550 = vperm.xlu0 %657, %v487_v46   ;;  %v485_v32 = vsub.f32 %v261_v45, %v453_v44 }
 0x113   :  { %547 = vperm.xlu2 %656, %v486_v35  }
 0x116   :  { %508 = vperm.xlu1 %658, %v473_v39  }
 0x11e   :  { %544 = vperm.xlu1 %658, %v485_v32  }
 0x138   :  { %v506_v12 = vpop.permute.xlu2 %505 }
 0x139   :  { %v552_v62 = vperm.slane %v506_v12, %v895_v42 }
 0x145   :  { %v515_v47 = vpop.permute.xlu2 %514 }
 0x146   :  { %v558_v36 = vperm.slane %v515_v47, %v553_v59 }
 0x14d   :  { %v521_v8 = vpop.permute.xlu2 %520 }
 0x14e   :  { %v561_v2 = vperm.slane %v521_v8, %v553_v59 }
 0x151   :  { %v518_v49 = vpop.permute.xlu1 %517 }
 0x152   :  { %v512_v54 = vpop.permute.xlu0 %511  ;;  %v560_v13 = vperm.slane %v518_v49, %v895_v42 }
 0x153   :  { %v557_v60 = vperm.slane %v512_v54, %v895_v42 }
 0x154   :  { %v562_v43 = vsel %vm555_vm2, %v561_v2, %v560_v13 }
 0x155   :  { %v527_v50 = vpop.permute.xlu2 %526  ;;  %v559_v37 = vsel %vm555_vm2, %v558_v36, %v557_v60 }
 0x156   :  { %v564_v5 = vperm.slane %v527_v50, %v553_v59 }
 0x159   :  { %v524_v51 = vpop.permute.xlu1 %523 }
 0x15a   :  { %v563_v0 = vperm.slane %v524_v51, %v895_v42 }
 0x15c   :  { %v565_v63 = vsel %vm555_vm2, %v564_v5, %v563_v0 }
 0x15d   :  { %v533_v56 = vpop.permute.xlu2 %532 }
 0x15e   :  { %v567_v9 = vperm.slane %v533_v56, %v553_v59 }
 0x161   :  { %v530_v52 = vpop.permute.xlu1 %529 }
 0x162   :  { %v566_v6 = vperm.slane %v530_v52, %v895_v42 }
 0x164   :  { %v568_v16 = vsel %vm555_vm2, %v567_v9, %v566_v6 }
 0x165   :  { %v539_v57 = vpop.permute.xlu2 %538 }
 0x166   :  { %v570_v17 = vperm.slane %v539_v57, %v553_v59 }
 0x16d   :  { %v548_v4 = vpop.permute.xlu2 %547 }
 0x16e   :  { %v575_v3 = vperm.slane %v548_v4, %v895_v42 }
 0x17b   :  { %v542_v34 = vpop.permute.xlu0 %541 }
 0x17c   :  { %v572_v19 = vperm.slane %v542_v34, %v895_v42 }
 0x180   :  { %v536_v55 = vpop.permute.xlu1 %535 }
 0x181   :  { %v569_v11 = vperm.slane %v536_v55, %v895_v42 }
 0x183   :  { %v551_v10 = vpop.permute.xlu0 %550  ;;  %v571_v25 = vsel %vm555_vm2, %v570_v17, %v569_v11 }
 0x184   :  { %v576_v15 = vperm.slane %v551_v10, %v553_v59 }
 0x186   :  { %v577_v27 = vsel %vm555_vm2, %v576_v15, %v575_v3 }
 0x188   :  { %v509_v61 = vpop.permute.xlu1 %508 }
 0x189   :  { %v554_v1 = vperm.slane %v509_v61, %v553_v59 }
 0x18b   :  { %v556_v20 = vsel %vm555_vm2, %v554_v1, %v552_v62 }
 0x18c   :  { %v579_v7 = vsel %vm578_vm3, %v559_v37, %v556_v20 }
 0x18d   :  { %v581_v24 = vsel %vm580_vm4, %v562_v43, %v579_v7 }
 0x18e   :  { %v583_v14 = vsel %vm582_vm5, %v565_v63, %v581_v24 }
 0x18f   :  { %v585_v48 = vsel %vm584_vm6, %v568_v16, %v583_v14 }
 0x190   :  { %v545_v18 = vpop.permute.xlu1 %544  ;;  %v587_v46 = vsel %vm586_vm7, %v571_v25, %v585_v48 }
 0x191   :  { %v573_v22 = vperm.slane %v545_v18, %v553_v59 }
 0x193   :  { %v574_v23 = vsel %vm555_vm2, %v573_v22, %v572_v19 }
 0x194   :  { %v589_v28 = vsel %vm588_vm8, %v574_v23, %v587_v46 }
 0x195   :  { %v591_v58 = vsel %vm590_vm9, %v577_v27, %v589_v28 }
 0x196   :  { %v594_v53 = vsel %vm593_vm10, %v591_v58, 0.0 }
 0x197   :  { %595 = vadd.xlane.f32.xlu1 %v594_v53 }
 0x20a   :  { %v596_v42 = vpop.xlane.xlu1 %595 }
 0x20b   :  { %v597_v40 = vsub.f32 0.0, %v596_v42 }
 0x20d   :  { %598 = vst [vmem:[#allocation10] sm:$0xff] %v597_v40 }
 0x20e   :  { %609 = dma.vmem_to_hbm [thread:$0]  %s605_s26, 128, %s607_s13, [#allocation9]  }
 0x20f   :  { %803 = dma.done.wait [#allocation9], 128  }
 0x210   :  { %804 = vsyncadd [#allocation9], 4294967168 }
 0x211   :  { %614 = vsyncpa [#allocation8], 1 }
 0x212   :  { %615 = vsyncpa [#allocation9], 1 }

</bundles_post_ra>
